<compile_context>
chip_gen: v7x
topology: tpu7x:2x2x1
jax: 0.10.0
libtpu: 0.0.40
codegen_flags: <defaults>
</compile_context>

<pallas_src>
import functools
import math

import numpy as np
import jax
import jax.numpy as jnp
from jax.experimental import pallas as pl
from jax.experimental.pallas import tpu as pltpu


def _pick_tile(dim, prefs):
    """Largest preferred tile that evenly divides `dim`; else the full dim."""
    for p in prefs:
        if dim >= p and dim % p == 0:
            return p
    return dim


# --------------------------- Linear: y = x @ W_t + b ------------------------ #

def _linear_kernel(x_ref, w_ref, b_ref, o_ref, acc_ref):
    # x: (tm, tk); w: (tk, tn) (weight already transposed to (d_in, d_out)); b: (1, tn)
    @pl.when(pl.program_id(2) == 0)
    def _init():
        acc_ref[...] = jnp.zeros_like(acc_ref)

    acc_ref[...] += jnp.dot(x_ref[...], w_ref[...],
                            preferred_element_type=jnp.float32)

    @pl.when(pl.program_id(2) == pl.num_programs(2) - 1)
    def _finalize():
        o_ref[...] = (acc_ref[...] + b_ref[...]).astype(o_ref.dtype)


def pallas_linear(x2d, w_t, b, *, out_dtype=jnp.float32):
    """x2d: (N, d_in); w_t: (d_in, d_out) pre-transposed; b: (d_out,) float32."""
    N, d_in = x2d.shape
    d_out = w_t.shape[1]
    # v6e likes 256-aligned tiles, v5e 128-aligned; fall back to the full dim for
    # small shapes (full-dim blocks always satisfy the (8,128) rule).
    tm = _pick_tile(N, (256, 128, 8))
    tn = _pick_tile(d_out, (256, 128))
    tk = _pick_tile(d_in, (512, 256, 128))
    b2d = b.reshape(1, d_out).astype(jnp.float32)
    grid = (N // tm, d_out // tn, d_in // tk)
    return pl.pallas_call(
        _linear_kernel,
        out_shape=jax.ShapeDtypeStruct((N, d_out), out_dtype),
        grid=grid,
        in_specs=[
            pl.BlockSpec((tm, tk), lambda i, j, k: (i, k)),
            pl.BlockSpec((tk, tn), lambda i, j, k: (k, j)),
            pl.BlockSpec((1, tn), lambda i, j, k: (0, j)),
        ],
        out_specs=pl.BlockSpec((tm, tn), lambda i, j, k: (i, j)),
        scratch_shapes=[pltpu.VMEM((tm, tn), jnp.float32)],
        compiler_params=pltpu.CompilerParams(
            dimension_semantics=("parallel", "parallel", "arbitrary")),
    )(x2d, w_t, b2d)


# ------------------------- Multi-head attention core ------------------------ #

def _attention_kernel(q_ref, k_ref, v_ref, m_ref, o_ref, *,
                      num_heads, scale, approx_recip):
    # q: (1, tq, D); k/v: (1, Lk, D); m: (1, tq, Lk) int8 (nonzero = masked); o: (1, tq, D)
    tq, D = q_ref.shape[1], q_ref.shape[2]
    lk = k_ref.shape[1]
    d_k = D // num_heads

    # Split heads in-register: (rows, D) -> (heads, rows, d_k), heads leading so
    # the dots are standard leading-batch batched matmuls on the MXU.
    q = jnp.swapaxes(q_ref[0].reshape(tq, num_heads, d_k), 0, 1)
    k = jnp.swapaxes(k_ref[0].reshape(lk, num_heads, d_k), 0, 1)
    v = jnp.swapaxes(v_ref[0].reshape(lk, num_heads, d_k), 0, 1)
    masked = m_ref[0].astype(jnp.int32) != 0                    # (tq, lk)

    # All heads in one batched dot, f32 accumulation.
    s = jnp.einsum("hqd,hkd->hqk", q, k,
                   preferred_element_type=jnp.float32) * jnp.float32(scale)
    s = jnp.where(masked[None, :, :], jnp.float32(-1e9), s)

    # Numerically stable softmax, kept entirely in f32 (important on v5e).
    s_max = jnp.max(s, axis=-1, keepdims=True)
    p = jnp.exp(s - s_max)
    denom = jnp.sum(p, axis=-1, keepdims=True)
    p = p * pl.reciprocal(denom, approx=approx_recip)

    out = jnp.einsum("hqk,hkd->hqd", p.astype(v.dtype), v,
                     preferred_element_type=jnp.float32)        # (h, tq, d_k)
    # Concatenate heads and store one lane-dense (tq, D) slab.
    o_ref[0] = jnp.swapaxes(out, 0, 1).reshape(tq, D).astype(o_ref.dtype)


def pallas_attention(q, k, v, mask_i8, *, num_heads, out_dtype, approx_recip):
    """q: (B, Lq, D); k/v: (B, Lk, D); mask_i8: (B, Lq, Lk), nonzero = masked."""
    B, Lq, D = q.shape
    Lk = k.shape[1]
    d_k = D // num_heads
    tq = _pick_tile(Lq, (256, 128))   # query tiling; full Lq for small sequences
    # TODO(synk): flash-style online-softmax tiling over the KV axis for long
    # sequences (needed to stay inside v7x's 64 MiB VMEM at L >~ 2k).
    # TODO(synk): known-causal masks could be generated in-kernel with
    # lax.broadcasted_iota instead of DMAing a tensor mask.
    kern = functools.partial(_attention_kernel, num_heads=num_heads,
                             scale=1.0 / math.sqrt(d_k),
                             approx_recip=approx_recip)
    return pl.pallas_call(
        kern,
        out_shape=jax.ShapeDtypeStruct((B, Lq, D), out_dtype),
        grid=(B, Lq // tq),
        in_specs=[
            pl.BlockSpec((1, tq, D), lambda b, qi: (b, qi, 0)),
            pl.BlockSpec((1, Lk, D), lambda b, qi: (b, 0, 0)),
            pl.BlockSpec((1, Lk, D), lambda b, qi: (b, 0, 0)),
            pl.BlockSpec((1, tq, Lk), lambda b, qi: (b, qi, 0)),
        ],
        out_specs=pl.BlockSpec((1, tq, D), lambda b, qi: (b, qi, 0)),
        compiler_params=pltpu.CompilerParams(
            dimension_semantics=("parallel", "parallel")),
    )(q, k, v, mask_i8)


# ------------------------------ Module wrapper ------------------------------ #

def prepare_params(params, compute_dtype=jnp.float32):
    """Pre-transpose torch-convention [out, in] weights to (in, out) once and cast
    them to the MXU compute dtype. Biases stay f32 (added to the f32 accumulator)."""
    cd = compute_dtype
    wq_t, wk_t, wv_t = params["wq"].T, params["wk"].T, params["wv"].T
    return {
        "compute_dtype": cd,
        "wq_t": wq_t.astype(cd),
        "wk_t": wk_t.astype(cd),
        "wv_t": wv_t.astype(cd),
        "wo_t": params["wo"].T.astype(cd),
        "w_qkv_t": jnp.concatenate([wq_t, wk_t, wv_t], axis=1).astype(cd),
        "bq": params["bq"].astype(jnp.float32),
        "bk": params["bk"].astype(jnp.float32),
        "bv": params["bv"].astype(jnp.float32),
        "bo": params["bo"].astype(jnp.float32),
        "b_qkv": jnp.concatenate(
            [params["bq"], params["bk"], params["bv"]]).astype(jnp.float32),
    }


def multi_head_attention(query, key, value, prep, h, mask=None):
    """query/key/value: (B, L, d_model). Returns (B, Lq, d_model) float32."""
    B, Lq, D = query.shape
    Lk = key.shape[1]
    cd = prep["compute_dtype"]
    approx_recip = (cd == jnp.bfloat16)

    if (query is key) and (key is value):
        # Self-attention: single fused QKV GEMM (one launch, one read of x).
        qkv = pallas_linear(query.reshape(B * Lq, D).astype(cd),
                            prep["w_qkv_t"], prep["b_qkv"], out_dtype=cd)
        qkv = qkv.reshape(B, Lq, 3, D)
        q, k, v = qkv[:, :, 0, :], qkv[:, :, 1, :], qkv[:, :, 2, :]
    else:
        q = pallas_linear(query.reshape(B * Lq, D).astype(cd),
                          prep["wq_t"], prep["bq"], out_dtype=cd).reshape(B, Lq, D)
        k = pallas_linear(key.reshape(B * Lk, D).astype(cd),
                          prep["wk_t"], prep["bk"], out_dtype=cd).reshape(B, Lk, D)
        v = pallas_linear(value.reshape(B * Lk, D).astype(cd),
                          prep["wv_t"], prep["bv"], out_dtype=cd).reshape(B, Lk, D)

    if mask is None:
        mask_i8 = jnp.zeros((B, Lq, Lk), jnp.int8)
    else:
        mask_i8 = jnp.broadcast_to(mask, (B, Lq, Lk)).astype(jnp.int8)

    attn = pallas_attention(q, k, v, mask_i8, num_heads=h,
                            out_dtype=cd, approx_recip=approx_recip)  # (B, Lq, D)

    out = pallas_linear(attn.reshape(B * Lq, D),
                        prep["wo_t"], prep["bo"], out_dtype=jnp.float32)
    return out.reshape(B, Lq, D)


# ----------------------------- Pure-JAX reference --------------------------- #

def reference_mha(query, key, value, params, h, mask=None):
    B, L, D = query.shape
    d_k = D // h

    def lin(x, w, b):
        return x @ w.T + b

    def split(x):
        return x.reshape(B, L, h, d_k).transpose(0, 2, 1, 3)

    q = split(lin(query, params["wq"], params["bq"]))
    k = split(lin(key, params["wk"], params["bk"]))
    v = split(lin(value, params["wv"], params["bv"]))
    scores = jnp.einsum("bhqd,bhkd->bhqk", q, k) / math.sqrt(d_k)
    if mask is not None:
        scores = jnp.where(mask.reshape(B, 1, L, L), -1e9, scores)
    p = jax.nn.softmax(scores, axis=-1)
    x = jnp.einsum("bhqk,bhkd->bhqd", p, v)
    x = x.transpose(0, 2, 1, 3).reshape(B, L, D)
    return lin(x, params["wo"], params["bo"])


# ----------------------------------- Main ----------------------------------- #

if __name__ == "__main__":
    # Small shapes consistent with the module: batch=2, seq=8, d_model=32, heads=4
    B, L, D, H = 2, 8, 32, 4
    key0 = jax.random.PRNGKey(0)
    ks = jax.random.split(key0, 12)

    bound = 1.0 / math.sqrt(D)  # torch nn.Linear default init range
    params = {
        "wq": jax.random.uniform(ks[0], (D, D), jnp.float32, -bound, bound),
        "bq": jax.random.uniform(ks[1], (D,), jnp.float32, -bound, bound),
        "wk": jax.random.uniform(ks[2], (D, D), jnp.float32, -bound, bound),
        "bk": jax.random.uniform(ks[3], (D,), jnp.float32, -bound, bound),
        "wv": jax.random.uniform(ks[4], (D, D), jnp.float32, -bound, bound),
        "bv": jax.random.uniform(ks[5], (D,), jnp.float32, -bound, bound),
        "wo": jax.random.uniform(ks[6], (D, D), jnp.float32, -bound, bound),
        "bo": jax.random.uniform(ks[7], (D,), jnp.float32, -bound, bound),
    }

    # causal-style mask (True = masked position), shape (B, L, L)
    tri = jnp.triu(jnp.ones((L, L), dtype=bool), k=1)
    mask = jnp.broadcast_to(tri, (B, L, L))

    # ---- f32 path, self-attention (fused QKV GEMM), tight tolerance ----
    x = jax.random.normal(ks[8], (B, L, D), jnp.float32)
    prep_f32 = prepare_params(params, jnp.float32)
    out_self = jax.block_until_ready(
        multi_head_attention(x, x, x, prep_f32, H, mask=mask))
    ref_self = reference_mha(x, x, x, params, H, mask=mask)
    np.testing.assert_allclose(np.asarray(out_self), np.asarray(ref_self),
                               atol=2e-4, rtol=1e-4)

    # ---- f32 path, distinct q/k/v (separate projections), tight tolerance ----
    q_in = jax.random.normal(ks[9], (B, L, D), jnp.float32)
    k_in = jax.random.normal(ks[10], (B, L, D), jnp.float32)
    v_in = jax.random.normal(ks[11], (B, L, D), jnp.float32)
    out_cross = jax.block_until_ready(
        multi_head_attention(q_in, k_in, v_in, prep_f32, H, mask=mask))
    ref_cross = reference_mha(q_in, k_in, v_in, params, H, mask=mask)
    np.testing.assert_allclose(np.asarray(out_cross), np.asarray(ref_cross),
                               atol=2e-4, rtol=1e-4)

    # ---- bf16 MXU path (f32 accumulation / f32 softmax), looser tolerance ----
    prep_bf16 = prepare_params(params, jnp.bfloat16)
    out_bf16 = jax.block_until_ready(
        multi_head_attention(x, x, x, prep_bf16, H, mask=mask))
    np.testing.assert_allclose(np.asarray(out_bf16), np.asarray(ref_self),
                               atol=5e-2, rtol=5e-2)

    print("KERNEL_OK")
</pallas_src>

<mosaic_0001>
module attributes {stable_mosaic.version = 11 : i64} {
  func.func @_linear_kernel(%arg0: i32, %arg1: i32, %arg2: i32, %arg3: memref<8x32xf32, #tpu.memory_space<vmem>>, %arg4: memref<32x96xf32, #tpu.memory_space<vmem>>, %arg5: memref<1x96xf32, #tpu.memory_space<vmem>>, %arg6: memref<8x96xf32, #tpu.memory_space<vmem>>, %arg7: memref<8x96xf32, #tpu.memory_space<vmem>>) attributes {dimension_semantics = [#tpu.dimension_semantics<parallel>, #tpu.dimension_semantics<parallel>, #tpu.dimension_semantics<arbitrary>], iteration_bounds = array<i64: 2, 1, 1>, scalar_prefetch = 0 : i64, scratch_operands = 1 : i64, tpu.core_type = #tpu.core_type<tc>, window_params = [{transform_indices = @transform_0, window_bounds = array<i64: 8, 32>}, {transform_indices = @transform_1, window_bounds = array<i64: 32, 96>}, {transform_indices = @transform_2, window_bounds = array<i64: 1, 96>}, {transform_indices = @transform_3, window_bounds = array<i64: 8, 96>}]} {
    %c0_i32 = arith.constant 0 : i32
    %0 = arith.cmpi eq, %arg2, %c0_i32 : i32
    %1 = arith.extui %0 : i1 to i32
    %c0_i32_0 = arith.constant 0 : i32
    %2 = arith.cmpi ne, %1, %c0_i32_0 : i32
    scf.if %2 {
      %cst_10 = arith.constant 0.000000e+00 : f32
      %12 = vector.broadcast %cst_10 : f32 to vector<8x96xf32>
      %c0_11 = arith.constant 0 : index
      %c0_12 = arith.constant 0 : index
      %13 = vector.load %arg7[%c0_11, %c0_12] : memref<8x96xf32, #tpu.memory_space<vmem>>, vector<8x96xf32>
      tpu.vector_store %arg7[%c0_11, %c0_12], %12 {strides = array<i32>} : memref<8x96xf32, #tpu.memory_space<vmem>>, vector<8x96xf32>,
    } else {
    }
    %c0 = arith.constant 0 : index
    %c0_1 = arith.constant 0 : index
    %3 = vector.load %arg7[%c0, %c0_1] : memref<8x96xf32, #tpu.memory_space<vmem>>, vector<8x96xf32>
    %c0_2 = arith.constant 0 : index
    %c0_3 = arith.constant 0 : index
    %4 = vector.load %arg3[%c0_2, %c0_3] : memref<8x32xf32, #tpu.memory_space<vmem>>, vector<8x32xf32>
    %c0_4 = arith.constant 0 : index
    %c0_5 = arith.constant 0 : index
    %5 = vector.load %arg4[%c0_4, %c0_5] : memref<32x96xf32, #tpu.memory_space<vmem>>, vector<32x96xf32>
    %cst = arith.constant dense<0.000000e+00> : vector<8x96xf32>
    %6 = tpu.matmul %4, %5, %cst {dimension_numbers = #tpu.dot_dimension_numbers<[1], [0], [0], [1], [0, 0, 1, 1], [], []>} : vector<8x32xf32>, vector<32x96xf32>, vector<8x96xf32> -> vector<8x96xf32>
    %7 = arith.addf %3, %6 : vector<8x96xf32>
    %c0_6 = arith.constant 0 : index
    %c0_7 = arith.constant 0 : index
    %8 = vector.load %arg7[%c0_6, %c0_7] : memref<8x96xf32, #tpu.memory_space<vmem>>, vector<8x96xf32>
    tpu.vector_store %arg7[%c0_6, %c0_7], %7 {strides = array<i32>} : memref<8x96xf32, #tpu.memory_space<vmem>>, vector<8x96xf32>,
    %c0_i32_8 = arith.constant 0 : i32
    %9 = arith.cmpi eq, %arg2, %c0_i32_8 : i32
    %10 = arith.extui %9 : i1 to i32
    %c0_i32_9 = arith.constant 0 : i32
    %11 = arith.cmpi ne, %10, %c0_i32_9 : i32
    scf.if %11 {
      %c0_10 = arith.constant 0 : index
      %c0_11 = arith.constant 0 : index
      %12 = vector.load %arg7[%c0_10, %c0_11] : memref<8x96xf32, #tpu.memory_space<vmem>>, vector<8x96xf32>
      %c0_12 = arith.constant 0 : index
      %c0_13 = arith.constant 0 : index
      %13 = vector.load %arg5[%c0_12, %c0_13] : memref<1x96xf32, #tpu.memory_space<vmem>>, vector<1x96xf32>
      %14 = vector.broadcast %13 : vector<1x96xf32> to vector<8x96xf32>
      %15 = arith.addf %12, %14 : vector<8x96xf32>
      %c0_14 = arith.constant 0 : index
      %c0_15 = arith.constant 0 : index
      %16 = vector.load %arg6[%c0_14, %c0_15] : memref<8x96xf32, #tpu.memory_space<vmem>>, vector<8x96xf32>
      tpu.vector_store %arg6[%c0_14, %c0_15], %15 {strides = array<i32>} : memref<8x96xf32, #tpu.memory_space<vmem>>, vector<8x96xf32>,
    } else {
    }
    return
  }
  func.func @transform_0(%arg0: i32, %arg1: i32, %arg2: i32) -> (i32, i32) {
    %c0_i32 = arith.constant 0 : i32
    return %arg0, %arg2 : i32, i32
  }
  func.func @transform_1(%arg0: i32, %arg1: i32, %arg2: i32) -> (i32, i32) {
    %c0_i32 = arith.constant 0 : i32
    return %arg2, %arg1 : i32, i32
  }
  func.func @transform_2(%arg0: i32, %arg1: i32, %arg2: i32) -> (i32, i32) {
    %c0_i32 = arith.constant 0 : i32
    %c0_i32_0 = arith.constant 0 : i32
    return %c0_i32, %arg1 : i32, i32
  }
  func.func @transform_3(%arg0: i32, %arg1: i32, %arg2: i32) -> (i32, i32) {
    %c0_i32 = arith.constant 0 : i32
    return %arg0, %arg1 : i32, i32
  }
}

</mosaic_0001>

<bundles_post_ra>
// kernel: tpu_custom_call.1
= control target key start
LH: loop header
LB: loop body
LE: loop exit
PB: predicated region body
PF: predicated region fallthrough
CT: control target
= control target key end

     0   :  { %8 = vsyncpa [#allocation4], 0  ;;  %s993_s0 = inlined_call_operand.hbm [shape: f32[16,32], index: 0, kind: input, shape index: {}]   ;;  %s994_s1 = inlined_call_operand.hbm [shape: f32[32,96], index: 1, kind: input, shape index: {}]   ;;  %s995_s2 = inlined_call_operand.vmem [shape: f32[1,96], index: 2, kind: input, shape index: {}]   ;;  %s996_s3 = inlined_call_operand.hbm [shape: f32[16,96], index: 3, kind: output, shape index: {}]  }
   0x1   :  { %10 = vsyncpa [#allocation4 + $0x1], 0 }
   0x2   :  { %11 = vsyncpa [#allocation7], 0 }
   0x3   :  { %12 = vsyncpa [#allocation5], 0 }
   0x4   :  { %14 = vsyncpa [#allocation5 + $0x1], 0  ;;  %s769_s12 = smov 0   ;;  %s771_s13 = smov 0  }
   0x5   :  { %s773_s14 = smov 0   ;;  %s775_s15 = smov 0  }
   0x6   :  { %s777_s16 = smov 0   ;;  %s779_s17 = smov 0  }
   0x7 LB: > { %s477_s18 = sadd.s32 4294967295, %s739_s17   ;;  %s478_s19 = sadd.s32 4294967294, %s739_s17   ;;  %s739_s17 = sphi %s779_s17, %s20_s17   ;;  %s735_s16 = sphi %s777_s16, %s1020_s16   ;;  %s731_s15 = sphi %s775_s15, %s1019_s15   ;;  %s727_s14 = sphi %s773_s14, %s1018_s14   ;;  %s723_s13 = sphi %s771_s13, %s1017_s13   ;;  %s719_s12 = sphi %s769_s12, %s1016_s12  }
   0x8   : > { %p61_p0 = scmp.ne.s32.totalorder %s723_s13, %s719_s12  ;;  %p803_p1 = scmp.eq.s32.totalorder %s477_s18, 0 }
   0x9   : > { %p807_p2 = scmp.eq.s32.totalorder %s477_s18, 1  ;;  %p147_p3 = scmp.eq.s32.totalorder %s478_s19, 1 }
   0xa   : > { %s1001_s20 = scalar_select %p803_p1, 1, 0 }
   0xb   : > { %s1002_s21 = scalar_select %p807_p2, 1, 0 }
   0xc   : > { %p813_p4 = por %p803_p1, %p61_p0  ;;  %p479_p5 = scmp.ge.s32.totalorder %s739_s17, 1 }
   0xd   : > { %p818_p6 = por %p147_p3, %p61_p0  ;;  %p154_p7 = scmp.lt.s32.totalorder %s739_s17, 3 }
   0xe   : > { %s1003_s22 = scalar_select %p813_p4, 1, 0 }
   0xf   : > { %s1004_s23 = scalar_select %p818_p6, 1, 0 }
  0x10   : > { %p823_p8 = pnand %p479_p5, %p154_p7  ;;  %s741_s25 = smov [#allocation6]  }
  0x11   : > { %s170_s26 = sshll.u32 %s741_s25, 4  ;;  %s39_s28 = sadd.s32 1, %s735_s16  ;;  %s171_s26 = int_to_ptr.vmem [resolvable:$true] %s170_s26 }
  0x12   : > { %s1005_s24 = scalar_select %p823_p8, 1, 0 }
  0x13   : > { %p525_p9 = pneg %p823_p8  ;;  %s595_s4 = scalar_lea.hbm %s994_s1, 512 }
  0x14   : > { %p596_p12 = scmp.ne.s32.totalorder %s994_s1, %s595_s4  ;;  %p602_p5 = scmp.lt.u32.totalorder %s595_s4, %s994_s1 }
  0x15   : > { %p832_p11 = pnand %p525_p9, %p803_p1 }
  0x17   : > { %p597_p13 = pneg %p832_p11 }
  0x19   : > { %p598_p0 = pnand %p597_p13, %p596_p12 }
  0x1b   : > { %p599_p3 = pneg %p598_p0 }
  0x1d   : > { %p604_p7 = pnand %p602_p5, %p599_p3 }
  0x1f   : > { %607 = shalt.err (!%p604_p7)
}
  0x20   : > { %s608_s9 = scalar_lea.vmem %s171_s26, 512  ;;  %p616_p1 = scmp.lt.s32.totalorder %s171_s26, %s171_s26 }
  0x21   : > { %p609_p9 = scmp.ne.s32.totalorder %s171_s26, %s608_s9  ;;  %p617_p4 = scmp.lt.s32.totalorder %s608_s9, %s608_s9 }
  0x23   : > { %p611_p10 = pnand %p609_p9, %p597_p13  ;;  %p618_p8 = por %p617_p4, %p616_p1 }
  0x25   : > { %p612_p6 = pneg %p611_p10 }
  0x27   : > { %p619_p2 = pnand %p618_p8, %p612_p6 }
  0x29   : > { %622 = shalt.err (!%p619_p2)
}
  0x2a   : > { %s742_s10 = smov 128   ;;  %s743_s11 = smov 8  }
  0x2b   : > { %528 = dma.hbm_to_vmem [thread:$0]  (!%p832_p11), %s994_s1, 512, %s171_s26, [#allocation7], %s742_s10, %s742_s10, %s743_s11  }
  0x2c   : > { %p41_p1 = scmp.ge.s32.totalorder %s39_s28, 2  ;;  %s48_s25 = sadd.s32 1, %s727_s14 }
  0x2d   : > { %p55_p2 = scmp.ne.s32.totalorder %s727_s14, %s723_s13  ;;  %p56_p4 = scmp.eq.s32.totalorder %s739_s17, 0 }
  0x2e   : > { %s1022_s28 = smov (%p41_p1, %s39_s28), 0  ;;  %p1008_p8 = scmp.ne.s32.totalorder %s1002_s21, 0 }
  0x2f   : > { %p859_p6 = por %p56_p4, %p55_p2  ;;  %s43_s27 = ssub.s32 %s735_s16, %s1022_s28 }
  0x30   : > { %p865_p10 = por %p1008_p8, %p55_p2  ;;  %p538_p12 = scmp.lt.s32.totalorder %s739_s17, 2 }
  0x31   : > { %p46_p11 = scmp.eq.s32.totalorder %s43_s27, 0  ;;  %s190_s26 = sand.u32 1, %s727_s14  }
  0x32   : > { %s483_s4 = sshll.u32 %s190_s26, 3  ;;  %s484_s6 = sshll.u32 %s735_s16, 7 }
  0x33   : > { %s874_s5 = scalar_select %p46_p11, %s727_s14, %s48_s25  }
  0x34   : > { %s880_s9 = scalar_lea.hbm %s993_s0, %s484_s6  ;;  %s194_s21 = scalar_lea.vmem [#allocation3], %s483_s4 }
  0x35   : > { %s202_s10 = sshll.u32 %s194_s21, 4  ;;  %p886_p13 = pnand %p538_p12, %p859_p6  ;;  %s882_s10 = int_to_ptr.vmem [resolvable:$true] %s202_s10 }
  0x36   : > { %s191_s18 = scalar_lea.sflag [#allocation4], %s190_s26  ;;  %s623_s19 = scalar_lea.hbm %s880_s9, 128 }
  0x37   : > { %p624_p0 = scmp.ne.s32.totalorder %s880_s9, %s623_s19  ;;  %p625_p3 = pneg %p886_p13 }
  0x38   : > { %s628_s4 = scalar_lea.hbm %s993_s0, 256  ;;  %p629_p9 = scmp.lt.u32.totalorder %s880_s9, %s993_s0 }
  0x39   : > { %p626_p5 = pnand %p625_p3, %p624_p0  ;;  %p630_p1 = scmp.lt.u32.totalorder %s628_s4, %s623_s19 }
  0x3a   : > { %p632_p4 = scmp.lt.u32.totalorder %s623_s19, %s880_s9 }
  0x3b   : > { %p627_p7 = pneg %p626_p5  ;;  %p631_p2 = por %p630_p1, %p629_p9 }
  0x3d   : > { %p633_p6 = por %p632_p4, %p631_p2 }
  0x3f   : > { %p634_p8 = pnand %p633_p6, %p627_p7 }
  0x41   : > { %637 = shalt.err (!%p634_p8)
}
  0x42   : > { %s638_s26 = scalar_lea.vmem %s882_s10, 128  ;;  %s744_s7 = smov [#allocation3]  }
  0x43   : > { %p639_p12 = scmp.ne.s32.totalorder %s882_s10, %s638_s26  ;;  %s643_s8 = sshll.u32 %s744_s7, 4  ;;  %s644_s8 = int_to_ptr.vmem [resolvable:$false] %s643_s8 }
  0x44   : > { %s645_s21 = scalar_lea.vmem %s644_s8, 256  ;;  %p646_p5 = scmp.lt.s32.totalorder %s882_s10, %s644_s8 }
  0x45   : > { %p641_p11 = pnand %p639_p12, %p625_p3  ;;  %p647_p9 = scmp.lt.s32.totalorder %s645_s21, %s638_s26 }
  0x47   : > { %p642_p0 = pneg %p641_p11  ;;  %p648_p1 = por %p647_p9, %p646_p5 }
  0x49   : > { %p649_p2 = pnand %p648_p1, %p642_p0 }
  0x4b   : > { %652 = shalt.err (!%p649_p2)
}
  0x4c   : > { %532 = dma.hbm_to_vmem [thread:$0]  (!%p886_p13), %s880_s9, 128, %s882_s10, %s191_s18  }
  0x4d   : > { %p1011_p7 = scmp.ne.s32.totalorder %s1005_s24, 0 }
  0x4e   : > { %s918_s19 = sand.u32 (!%p1011_p7), 1, %s723_s13   ;;  %p1012_p3 = scmp.ne.s32.totalorder (!%p1011_p7), %s1003_s22, 0 }
  0x4f   : > { %211 = sbr.rel (%p1011_p7) target bundleno = 339 (0x153), region = 32  ;;  %s486_s25 = sshll.u32 (!%p1011_p7), %s918_s19, 3 }
  0x50   : > { %s214_s27 = scalar_lea.sflag (!%p1011_p7), [#allocation4], %s918_s19  ;;  %s217_s4 = scalar_lea.vmem (!%p1011_p7), [#allocation3], %s486_s25 }
  0x56   : > { %706 = dma.done.wait (%p1012_p3), %s214_s27, 128  }
  0x57   : > { %708 = vsyncadd (%p1012_p3), %s214_s27, 4294967168  ;;  %p1013_p13 = scmp.ne.s32.totalorder %s1001_s20, 0 }
  0x59   : > { %710 = dma.done.wait (%p1013_p13), [#allocation7], 512  }
  0x5a   : > { %712 = vsyncadd (%p1013_p13), [#allocation7], 4294966784  ;;  %vm255_vm0 = vcmask 785408   ;;  %v745_v0 = vmov 0.0|0.0   ;;  %v746_v1 = vmov 0.0   ;;  %vm747_vm1 = vmmov 0  }
  0x5b   : > { %511 = vmatprep.subr.bf16.mxu0 %v745_v0  ;;  %256 = vst.msk [vmem:[#allocation2] sm:$0xff] %vm255_vm0, %v746_v1  ;;  %508 = vmatprep.mubr.msk.f32.mxu0 %vm747_vm1, %v746_v1  ;;  %v259_v2 = vld [vmem:[#allocation6] sm:$0xff]  ;;  %v260_v3 = vld [vmem:[#allocation6 + $0x8] sm:$0xff]  ;;  %v261_v4 = vld [vmem:[#allocation6 + $0x10] sm:$0xff]  ;;  %vm263_vm2 = vcmask 261120   ;;  %s492_s24 = sshll.u32 %s731_s15, 7 }
  0x5c   : > { %v512_v5 = vpack.c.bf16 %v260_v3, %v259_v2  ;;  %v262_v6 = vld [vmem:[#allocation6 + $0x18] sm:$0xff]  ;;  %v490_v13 = vld [vmem:[%s995_s2] ss:$0 sm:$0xff]  ;;  %s246_s9 = scalar_lea.vmem [#allocation8], %s486_s25  ;;  %s943_s29 = scalar_lea.hbm %s996_s3, %s492_s24 }
  0x5d   : > { %v515_v7 = vpack.c.bf16 %v262_v6, %v261_v4  ;;  %v258_v8 = vld [vmem:[%s217_s4] sm:$0xff]  ;;  %s368_s10 = sshll.u32 %s246_s9, 4  ;;  %s354_s6 = scalar_lea.sflag [#allocation5], %s918_s19  ;;  %s945_s10 = int_to_ptr.vmem [resolvable:$true] %s368_s10 }
  0x5e   : > { %513 = vmatpush3.bf16.msra.mxu0 %v512_v5  ;;  %s653_s26 = scalar_lea.vmem %s945_s10, 128  ;;  %s748_s15 = smov [#allocation8]  }
  0x5f   : > { %514 = vmatprep.subr.bf16.mxu0 %v745_v0  ;;  %p654_p4 = scmp.ne.s32.totalorder %s945_s10, %s653_s26  ;;  %s657_s7 = sshll.u32 %s748_s15, 4  ;;  %s658_s7 = int_to_ptr.vmem [resolvable:$false] %s657_s7 }
  0x60   : > { %s659_s8 = scalar_lea.vmem %s658_s7, 256  ;;  %p660_p12 = scmp.lt.s32.totalorder %s945_s10, %s658_s7 }
  0x61   : > { %p655_p6 = pnand %p654_p4, %p865_p10  ;;  %p661_p11 = scmp.lt.s32.totalorder %s659_s8, %s653_s26 }
  0x62   : > { %516 = vmatpush3.bf16.msra.mxu0 %v515_v7  ;;  %v257_v9 = vld [vmem:[#allocation2] sm:$0xff] }
  0x63   : > { %p656_p8 = pneg %p655_p6  ;;  %p662_p0 = por %p661_p11, %p660_p12 }
  0x65   : > { %509 = vmatmul.mubr.msk.f32.vlgmr.msra.gmra.mrb[0].mxu0 %vm263_vm2, %v258_v8  ;;  %p663_p5 = pnand %p662_p0, %p656_p8 }
 0x138   : > { %v333_v10 = vpop.f32.mrb[0].mxu0 }
 0x139   : > { %v337_v11 = vadd.f32 %v333_v10, %v257_v9  ;;  %v510_v12 = vpop.f32.mrb[1].mxu0 }
 0x13b   : > { %339 = vst.msk [vmem:[#allocation2] sm:$0xff] %vm255_vm0, %v337_v11 }
 0x142   : > { %v343_v14 = vld [vmem:[#allocation2] sm:$0xff] }
 0x143   : > { %v351_v15 = vadd.f32 %v490_v13, %v343_v14 }
 0x145   : > { %352 = vst.msk [vmem:[%s246_s9] sm:$0xff] %vm255_vm0, %v351_v15 }
 0x146   : > { %666 = shalt.err (!%p663_p5)
}
 0x147   : > { %s667_s21 = scalar_lea.hbm %s943_s29, 128  ;;  %s671_s27 = scalar_lea.hbm %s996_s3, 256 }
 0x148   : > { %p668_p9 = scmp.ne.s32.totalorder %s943_s29, %s667_s21  ;;  %p672_p7 = scmp.lt.u32.totalorder %s943_s29, %s996_s3 }
 0x149   : > { %p673_p3 = scmp.lt.u32.totalorder %s671_s27, %s667_s21  ;;  %p675_p4 = scmp.lt.u32.totalorder %s667_s21, %s943_s29 }
 0x14a   : > { %p669_p1 = pnand %p668_p9, %p865_p10 }
 0x14b   : > { %p674_p13 = por %p673_p3, %p672_p7 }
 0x14c   : > { %p670_p2 = pneg %p669_p1 }
 0x14d   : > { %p676_p6 = por %p675_p4, %p674_p13 }
 0x14f   : > { %p677_p8 = pnand %p676_p6, %p670_p2 }
 0x151   : > { %680 = shalt.err (!%p677_p8)
}
 0x152   : > { %523 = dma.vmem_to_hbm [thread:$0]  (%p865_p10), %s945_s10, 128, %s943_s29, %s354_s6  }
 0x153 PF: > { %s380_s22 = sand.u32 1, %s719_s12   ;;  %p1014_p12 = scmp.ne.s32.totalorder %s1004_s23, 0 }
 0x154   : > { %p1015_p11 = scmp.ge.s32.totalorder %s739_s17, 2  ;;  %s381_s24 = scalar_lea.sflag [#allocation5], %s380_s22 }
 0x156   : > { %p534_p0 = pnand %p1015_p11, %p1014_p12 }
 0x158   : > { %714 = dma.done.wait (!%p534_p0), %s381_s24, 128  }
 0x159   : > { %716 = vsyncadd (!%p534_p0), %s381_s24, 4294967168  ;;  %s20_s17 = sadd.s32 1, %s739_s17   ;;  %s1016_s12 = smov %s723_s13 }
 0x15a   : > { %p17_p5 = scmp.ge.s32.totalorder %s20_s17, 4   ;;  %s1017_s13 = smov %s727_s14 }
 0x15b   : > { %s1018_s14 = smov %s874_s5  ;;  %s1019_s15 = smov %s735_s16 }
 0x15c   : > { %s1020_s16 = smov %s1022_s28  ;;  %19 = sbr.rel (!%p17_p5) target bundleno = 7 (0x7), region = 93 }
 0x163   :  { %386 = vsyncpa [#allocation4], 1 }
 0x164   :  { %388 = vsyncpa [#allocation4 + $0x1], 1 }
 0x165   :  { %389 = vsyncpa [#allocation7], 1 }
 0x166   :  { %390 = vsyncpa [#allocation5], 1 }
 0x167   :  { %392 = vsyncpa [#allocation5 + $0x1], 1 }

</bundles_post_ra>
